<compile_context>
chip_gen: v6e
topology: v6e:2x2x1
jax: 0.10.0
libtpu: 0.0.40
codegen_flags: <defaults>
</compile_context>

<pallas_src>
import jax
import jax.numpy as jnp
from jax.experimental import pallas as pl
from jax.experimental.pallas import tpu as pltpu


def _round_up(v, m):
    return (v + m - 1) // m * m


def _grad_kernel(x0_ref, x1_ref, b0_ref, b1_ref, g_ref):
    # g_tile = x0_tile @ B0 + x1_tile @ B1, where [B0; B1] = 2 * W @ W^T with
    # each segment's gradient columns padded to a 128-lane boundary.
    # Both dots are independent (no serial fwd->bwd chain); f32 MXU accumulate.
    acc = jnp.dot(x0_ref[...], b0_ref[...], preferred_element_type=jnp.float32)
    acc = acc + jnp.dot(x1_ref[...], b1_ref[...],
                        preferred_element_type=jnp.float32)
    g_ref[...] = acc.astype(g_ref.dtype)


def _pick_tm(n, bytes_per_row, *, target_tile_bytes=2 << 20):
    """Byte-targeted batch tile (rows), always a multiple of 8."""
    n = max(int(n), 1)
    if n * bytes_per_row <= 2 * target_tile_bytes:
        # Small / latency-bound launch: one grid step avoids the ~0.35us
        # per-step overhead (v5e/v6e have a single TensorCore anyway).
        return _round_up(n, 8)
    tm = target_tile_bytes // max(bytes_per_row, 1)
    tm = max(8, (int(tm) // 8) * 8)
    steps = -(-n // tm)
    if steps > 1 and steps % 2:
        # Keep the grid length even so both v7x TensorCores get balanced work.
        steps += 1
        tm = _round_up(-(-n // steps), 8)
    return tm


def grad_module(x0, x1, w0, w1, *, compute_dtype=None, out_dtype=None):
    """Pallas equivalent of Grad(m)([x0, x1]) for the linear segmented stand-in."""
    N, D0 = x0.shape
    N1, D1 = x1.shape
    assert N == N1
    assert w0.shape[0] == D0 and w1.shape[0] == D1 and w0.shape[1] == w1.shape[1]
    K = D0 + D1

    cdt = jnp.dtype(compute_dtype) if compute_dtype is not None else jnp.dtype(x0.dtype)
    odt = jnp.dtype(out_dtype) if out_dtype is not None else jnp.dtype(x0.dtype)
    itemsize = cdt.itemsize

    # --- Fused gradient operator, built once in the wrapper -----------------
    # M = 2 * W @ W^T (K x K).  Each input segment's gradient columns are
    # placed at a 128-aligned lane offset so the kernel output slab is
    # lane-dense and the per-segment unpack slices are 128-aligned.
    D0p = _round_up(D0, 128)
    D1p = _round_up(D1, 128)
    Dp = D0p + D1p
    w = jnp.concatenate([w0.astype(jnp.float32), w1.astype(jnp.float32)], axis=0)
    m = 2.0 * (w @ w.T)                                    # (K, K), f32
    mp = jnp.zeros((K, Dp), jnp.float32)
    mp = mp.at[:, :D0].set(m[:, :D0]).at[:, D0p:D0p + D1].set(m[:, D0:])
    b0 = mp[:D0].astype(cdt)                               # (D0, Dp)
    b1 = mp[D0:].astype(cdt)                               # (D1, Dp)

    # --- Byte-targeted batch tiling ------------------------------------------
    bytes_per_row = K * itemsize + Dp * odt.itemsize       # x row + g row
    tm = _pick_tm(N, bytes_per_row)
    Npad = _round_up(N, tm)
    grid = (Npad // tm,)

    x0c = x0.astype(cdt)
    x1c = x1.astype(cdt)
    if Npad != N:
        # Rare remainder path only: pad the batch with zero rows (padded rows
        # produce zero gradients, sliced off below).  The common aligned case
        # passes x0/x1 straight through with NO wrapper copy or concat.
        x0c = jnp.pad(x0c, ((0, Npad - N), (0, 0)))
        x1c = jnp.pad(x1c, ((0, Npad - N), (0, 0)))

    # Weight specs: constant index map -> fetched once.  Single-buffer them
    # only when large, so big row tiles stay viable within v7x's 64 MiB VMEM.
    weight_bytes = (b0.size + b1.size) * itemsize
    w_kwargs = {"pipeline_mode": pl.Buffered(1)} if weight_bytes >= (8 << 20) else {}
    b0_spec = pl.BlockSpec((D0, Dp), lambda i: (0, 0), **w_kwargs)
    b1_spec = pl.BlockSpec((D1, Dp), lambda i: (0, 0), **w_kwargs)

    flops = 2 * Npad * K * Dp
    bytes_accessed = (Npad * K * itemsize              # x0 + x1
                      + weight_bytes                   # b0 + b1
                      + Npad * Dp * odt.itemsize)      # gradient slab
    cost = pl.CostEstimate(flops=flops, transcendentals=0,
                           bytes_accessed=bytes_accessed)

    vmem_needed = (2 * tm * bytes_per_row              # double-buffered x/g tiles
                   + (1 if w_kwargs else 2) * weight_bytes
                   + (1 << 20))                        # slack
    vmem_limit = int(min(64 << 20, max(2 * vmem_needed, 16 << 20)))

    g = pl.pallas_call(
        _grad_kernel,
        out_shape=jax.ShapeDtypeStruct((Npad, Dp), odt),
        grid=grid,
        in_specs=[
            pl.BlockSpec((tm, D0), lambda i: (i, 0)),
            pl.BlockSpec((tm, D1), lambda i: (i, 0)),
            b0_spec,
            b1_spec,
        ],
        out_specs=pl.BlockSpec((tm, Dp), lambda i: (i, 0)),
        compiler_params=pltpu.CompilerParams(
            dimension_semantics=("parallel",),
            vmem_limit_bytes=vmem_limit),
        cost_estimate=cost,
    )(x0c, x1c, b0, b1)

    # Per-segment unpack: both slices start at 128-aligned lane offsets
    # (0 and D0p), so this is a cheap aligned slice, not a relayout.
    return g[:N, :D0], g[:N, D0p:D0p + D1]


def _reference(x0, x1, w0, w1):
    """Pure-JAX reference: autodiff of sum(m(inputs)**2) w.r.t. inputs."""
    def scalar(a, b):
        y = a @ w0 + b @ w1
        return jnp.sum(y ** 2)
    return jax.grad(scalar, argnums=(0, 1))(x0, x1)


if __name__ == "__main__":
    key = jax.random.PRNGKey(0)
    k0, k1, k2, k3 = jax.random.split(key, 4)

    # small shapes: batch=128, input segments 64 / 32 features, output 128
    N, D0, D1, DOUT = 128, 64, 32, 128
    x0 = jax.random.normal(k0, (N, D0), dtype=jnp.float32)
    x1 = jax.random.normal(k1, (N, D1), dtype=jnp.float32)
    # deterministic "parameters" of the inner segmented module m
    w0 = jax.random.normal(k2, (D0, DOUT), dtype=jnp.float32) * 0.1
    w1 = jax.random.normal(k3, (D1, DOUT), dtype=jnp.float32) * 0.1

    # f32 path (default)
    g0, g1 = grad_module(x0, x1, w0, w1)
    jax.block_until_ready((g0, g1))
    r0, r1 = _reference(x0, x1, w0, w1)
    assert jnp.allclose(g0, r0, atol=1e-3, rtol=1e-3)
    assert jnp.allclose(g1, r1, atol=1e-3, rtol=1e-3)

    # non-multiple batch (remainder handled by the rare padding path)
    g0b, g1b = grad_module(x0[:100], x1[:100], w0, w1)
    r0b, r1b = _reference(x0[:100], x1[:100], w0, w1)
    assert jnp.allclose(g0b, r0b, atol=1e-3, rtol=1e-3)
    assert jnp.allclose(g1b, r1b, atol=1e-3, rtol=1e-3)

    # bf16 compute path (memory-bound win on v5e/v6e/v7x), f32 gradients out
    g0c, g1c = grad_module(x0, x1, w0, w1,
                           compute_dtype=jnp.bfloat16, out_dtype=jnp.float32)
    assert jnp.allclose(g0c, r0, atol=0.1, rtol=0.05)
    assert jnp.allclose(g1c, r1, atol=0.1, rtol=0.05)

    print("KERNEL_OK")
</pallas_src>

<mosaic_0001>
module attributes {stable_mosaic.version = 11 : i64} {
  func.func @_grad_kernel(%arg0: i32, %arg1: memref<128x64xf32, #tpu.memory_space<vmem>>, %arg2: memref<128x32xf32, #tpu.memory_space<vmem>>, %arg3: memref<64x256xf32, #tpu.memory_space<vmem>>, %arg4: memref<32x256xf32, #tpu.memory_space<vmem>>, %arg5: memref<128x256xf32, #tpu.memory_space<vmem>>) attributes {dimension_semantics = [#tpu.dimension_semantics<parallel>], iteration_bounds = array<i64: 1>, scalar_prefetch = 0 : i64, scratch_operands = 0 : i64, tpu.core_type = #tpu.core_type<tc>, window_params = [{transform_indices = @transform_0, window_bounds = array<i64: 128, 64>}, {transform_indices = @transform_1, window_bounds = array<i64: 128, 32>}, {pipeline_mode = #tpu.pipeline_mode<synchronous>, transform_indices = @transform_2, window_bounds = array<i64: 64, 256>}, {pipeline_mode = #tpu.pipeline_mode<synchronous>, transform_indices = @transform_3, window_bounds = array<i64: 32, 256>}, {transform_indices = @transform_4, window_bounds = array<i64: 128, 256>}]} {
    %c0 = arith.constant 0 : index
    %c0_0 = arith.constant 0 : index
    %0 = vector.load %arg1[%c0, %c0_0] : memref<128x64xf32, #tpu.memory_space<vmem>>, vector<128x64xf32>
    %c0_1 = arith.constant 0 : index
    %c0_2 = arith.constant 0 : index
    %1 = vector.load %arg3[%c0_1, %c0_2] : memref<64x256xf32, #tpu.memory_space<vmem>>, vector<64x256xf32>
    %cst = arith.constant dense<0.000000e+00> : vector<128x256xf32>
    %2 = tpu.matmul %0, %1, %cst {dimension_numbers = #tpu.dot_dimension_numbers<[1], [0], [0], [1], [0, 0, 1, 1], [], []>} : vector<128x64xf32>, vector<64x256xf32>, vector<128x256xf32> -> vector<128x256xf32>
    %c0_3 = arith.constant 0 : index
    %c0_4 = arith.constant 0 : index
    %3 = vector.load %arg2[%c0_3, %c0_4] : memref<128x32xf32, #tpu.memory_space<vmem>>, vector<128x32xf32>
    %c0_5 = arith.constant 0 : index
    %c0_6 = arith.constant 0 : index
    %4 = vector.load %arg4[%c0_5, %c0_6] : memref<32x256xf32, #tpu.memory_space<vmem>>, vector<32x256xf32>
    %cst_7 = arith.constant dense<0.000000e+00> : vector<128x256xf32>
    %5 = tpu.matmul %3, %4, %cst_7 {dimension_numbers = #tpu.dot_dimension_numbers<[1], [0], [0], [1], [0, 0, 1, 1], [], []>} : vector<128x32xf32>, vector<32x256xf32>, vector<128x256xf32> -> vector<128x256xf32>
    %6 = arith.addf %2, %5 : vector<128x256xf32>
    %c0_8 = arith.constant 0 : index
    %c0_9 = arith.constant 0 : index
    %7 = vector.load %arg5[%c0_8, %c0_9] : memref<128x256xf32, #tpu.memory_space<vmem>>, vector<128x256xf32>
    tpu.vector_store %arg5[%c0_8, %c0_9], %6 {strides = array<i32>} : memref<128x256xf32, #tpu.memory_space<vmem>>, vector<128x256xf32>,
    return
  }
  func.func @transform_0(%arg0: i32) -> (i32, i32) {
    %c0_i32 = arith.constant 0 : i32
    %c0_i32_0 = arith.constant 0 : i32
    return %arg0, %c0_i32 : i32, i32
  }
  func.func @transform_1(%arg0: i32) -> (i32, i32) {
    %c0_i32 = arith.constant 0 : i32
    %c0_i32_0 = arith.constant 0 : i32
    return %arg0, %c0_i32 : i32, i32
  }
  func.func @transform_2(%arg0: i32) -> (i32, i32) {
    %c0_i32 = arith.constant 0 : i32
    %c0_i32_0 = arith.constant 0 : i32
    %c0_i32_1 = arith.constant 0 : i32
    return %c0_i32, %c0_i32_0 : i32, i32
  }
  func.func @transform_3(%arg0: i32) -> (i32, i32) {
    %c0_i32 = arith.constant 0 : i32
    %c0_i32_0 = arith.constant 0 : i32
    %c0_i32_1 = arith.constant 0 : i32
    return %c0_i32, %c0_i32_0 : i32, i32
  }
  func.func @transform_4(%arg0: i32) -> (i32, i32) {
    %c0_i32 = arith.constant 0 : i32
    %c0_i32_0 = arith.constant 0 : i32
    return %arg0, %c0_i32 : i32, i32
  }
}

</mosaic_0001>

<bundles_post_ra>
// kernel: tpu_custom_call.1
= control target key start
LH: loop header
LB: loop body
LE: loop exit
PB: predicated region body
PF: predicated region fallthrough
CT: control target
= control target key end

     0   :  { %vm74_vm0 = vcmask 261120   ;;  %v616_v18 = vmov 0.0   ;;  %vm284_vm1 = vcmask 523264   ;;  %s890_s0 = inlined_call_operand.vmem [shape: f32[128,64], index: 0, kind: input, shape index: {}]   ;;  %s891_s1 = inlined_call_operand.vmem [shape: f32[128,32], index: 1, kind: input, shape index: {}]   ;;  %s892_s2 = inlined_call_operand.vmem [shape: f32[64,256], index: 2, kind: input, shape index: {}]   ;;  %s893_s3 = inlined_call_operand.vmem [shape: f32[32,256], index: 3, kind: input, shape index: {}]   ;;  %s894_s4 = inlined_call_operand.hbm [shape: f32[128,256], index: 4, kind: output, shape index: {}]  }
   0x1   :  { %v73_v0 = vld [vmem:[%s893_s3 + $0x38] sm:$0xff]  ;;  %v72_v2 = vld [vmem:[%s893_s3 + $0x30] sm:$0xff]  ;;  %v71_v4 = vld [vmem:[%s893_s3 + $0x28] sm:$0xff]  ;;  %187 = vmatprep.mubr.f32.mxu0 %v616_v18  ;;  %403 = vmatprep.mubr.f32.mxu1 %v616_v18 }
   0x2   :  { %v49_v1 = vld [vmem:[%s892_s2 + $0x78] sm:$0xff]  ;;  %147 = vmatprep.subr.mxu0 %v73_v0  ;;  %v48_v3 = vld [vmem:[%s892_s2 + $0x70] sm:$0xff]  ;;  %v47_v5 = vld [vmem:[%s892_s2 + $0x68] sm:$0xff] }
   0x3   :  { %574 = vmatprep.subr.mxu1 %v49_v1  ;;  %148 = vmatpush1.msra.mxu0 %v72_v2  ;;  %v70_v6 = vld [vmem:[%s893_s3 + $0x20] sm:$0xff]  ;;  %v69_v8 = vld [vmem:[%s893_s3 + $0x18] sm:$0xff]  ;;  %v68_v10 = vld [vmem:[%s893_s3 + $0x10] sm:$0xff] }
   0x4   :  { %582 = vmatpush1.msra.mxu1 %v48_v3  ;;  %v46_v7 = vld [vmem:[%s892_s2 + $0x60] sm:$0xff]  ;;  %149 = vmatprep.subr.mxu0 %v71_v4  ;;  %v45_v9 = vld [vmem:[%s892_s2 + $0x58] sm:$0xff]  ;;  %v44_v11 = vld [vmem:[%s892_s2 + $0x50] sm:$0xff] }
   0x5   :  { %575 = vmatprep.subr.mxu1 %v47_v5  ;;  %150 = vmatpush1.msra.mxu0 %v70_v6  ;;  %v67_v12 = vld [vmem:[%s893_s3 + $0x8] sm:$0xff]  ;;  %v66_v14 = vld [vmem:[%s893_s3] sm:$0xff]  ;;  %v41_v17 = vld [vmem:[%s892_s2 + $0x38] sm:$0xff] }
   0x6   :  { %583 = vmatpush1.msra.mxu1 %v46_v7  ;;  %v43_v13 = vld [vmem:[%s892_s2 + $0x48] sm:$0xff]  ;;  %151 = vmatprep.subr.mxu0 %v69_v8  ;;  %v42_v15 = vld [vmem:[%s892_s2 + $0x40] sm:$0xff]  ;;  %v40_v19 = vld [vmem:[%s892_s2 + $0x30] sm:$0xff] }
   0x7   :  { %576 = vmatprep.subr.mxu1 %v45_v9  ;;  %152 = vmatpush1.msra.mxu0 %v68_v10  ;;  %v50_v16 = vld [vmem:[%s891_s1] sm:$0xff]  ;;  %v39_v20 = vld [vmem:[%s892_s2 + $0x28] sm:$0xff]  ;;  %v37_v23 = vld [vmem:[%s892_s2 + $0x18] sm:$0xff] }
   0x8   :  { %584 = vmatpush1.msra.mxu1 %v44_v11  ;;  %153 = vmatprep.subr.mxu0 %v67_v12  ;;  %v38_v21 = vld [vmem:[%s892_s2 + $0x20] sm:$0xff]  ;;  %v51_v22 = vld [vmem:[%s891_s1 + $0x8] sm:$0xff]  ;;  %v36_v24 = vld [vmem:[%s892_s2 + $0x10] sm:$0xff] }
   0x9   :  { %577 = vmatprep.subr.mxu1 %v43_v13  ;;  %154 = vmatpush1.msra.mxu0 %v66_v14  ;;  %v35_v25 = vld [vmem:[%s892_s2 + $0x8] sm:$0xff]  ;;  %v728_v26 = vld [vmem:[%s892_s2] sm:$0xff]  ;;  %v52_v27 = vld [vmem:[%s891_s1 + $0x10] sm:$0xff] }
   0xa   :  { %585 = vmatpush1.msra.mxu1 %v42_v15  ;;  %542 = vmatmul.mubr.msk.f32.vlgmr.msra.gmra.mxu0 %vm74_vm0, %v50_v16  ;;  %v19_v28 = vld [vmem:[%s890_s0 + $0x8] sm:$0xff]  ;;  %v53_v29 = vld [vmem:[%s891_s1 + $0x18] sm:$0xff] }
   0xb   :  { %349 = vmatprep.subr.mxu0 %v49_v1  ;;  %578 = vmatprep.subr.mxu1 %v41_v17 }
   0xc   :  { %350 = vmatpush1.msra.mxu0 %v48_v3  ;;  %586 = vmatpush1.msra.mxu1 %v40_v19 }
   0xd   :  { %579 = vmatprep.subr.mxu1 %v39_v20  ;;  %193 = vmatprep.mubr.f32.mxu0 %v616_v18 }
   0xe   :  { %587 = vmatpush1.msra.mxu1 %v38_v21  ;;  %543 = vmatmul.mubr.msk.f32.gmra.mxu0 %vm74_vm0, %v51_v22 }
   0xf   :  { %580 = vmatprep.subr.mxu1 %v37_v23  ;;  %199 = vmatprep.mubr.f32.mxu0 %v616_v18 }
  0x10   :  { %588 = vmatpush1.msra.mxu1 %v36_v24  ;;  %351 = vmatprep.subr.mxu0 %v47_v5 }
  0x11   :  { %581 = vmatprep.subr.mxu1 %v35_v25  ;;  %352 = vmatpush1.msra.mxu0 %v46_v7 }
  0x12   :  { %589 = vmatpush1.msra.mxu1 %v728_v26  ;;  %544 = vmatmul.mubr.msk.f32.gmra.mxu0 %vm74_vm0, %v52_v27 }
  0x13   :  { %559 = vmatmul.mubr.msk.f32.vlgmr.msra.gmra.mxu1 %vm284_vm1, %v19_v28 }
  0x14   :  { %9 = vsyncpa [#allocation3], 0  ;;  %205 = vmatprep.mubr.f32.mxu0 %v616_v18  ;;  %409 = vmatprep.mubr.f32.mxu1 %v616_v18  ;;  %v20_v30 = vld [vmem:[%s890_s0 + $0x10] sm:$0xff]  ;;  %v54_v31 = vld [vmem:[%s891_s1 + $0x20] sm:$0xff] }
  0x15   :  { %353 = vmatprep.subr.mxu0 %v45_v9  ;;  %v21_v32 = vld [vmem:[%s890_s0 + $0x18] sm:$0xff]  ;;  %v55_v33 = vld [vmem:[%s891_s1 + $0x28] sm:$0xff]  ;;  %v22_v34 = vld [vmem:[%s890_s0 + $0x20] sm:$0xff] }
  0x16   :  { %545 = vmatmul.mubr.msk.f32.gmra.mxu0 %vm74_vm0, %v53_v29  ;;  %v56_v35 = vld [vmem:[%s891_s1 + $0x30] sm:$0xff]  ;;  %v23_v36 = vld [vmem:[%s890_s0 + $0x28] sm:$0xff]  ;;  %v57_v37 = vld [vmem:[%s891_s1 + $0x38] sm:$0xff] }
  0x17   :  { %560 = vmatmul.mubr.msk.f32.gmra.mxu1 %vm284_vm1, %v20_v30  ;;  %211 = vmatprep.mubr.f32.mxu0 %v616_v18  ;;  %v24_v38 = vld [vmem:[%s890_s0 + $0x30] sm:$0xff]  ;;  %v58_v39 = vld [vmem:[%s891_s1 + $0x40] sm:$0xff]  ;;  %v25_v40 = vld [vmem:[%s890_s0 + $0x38] sm:$0xff] }
  0x18   :  { %415 = vmatprep.mubr.f32.mxu1 %v616_v18  ;;  %354 = vmatpush1.msra.mxu0 %v44_v11  ;;  %v59_v41 = vld [vmem:[%s891_s1 + $0x48] sm:$0xff]  ;;  %v26_v42 = vld [vmem:[%s890_s0 + $0x40] sm:$0xff]  ;;  %v60_v43 = vld [vmem:[%s891_s1 + $0x50] sm:$0xff] }
  0x19   :  { %355 = vmatprep.subr.mxu0 %v43_v13  ;;  %v27_v44 = vld [vmem:[%s890_s0 + $0x48] sm:$0xff]  ;;  %v61_v45 = vld [vmem:[%s891_s1 + $0x58] sm:$0xff]  ;;  %v28_v46 = vld [vmem:[%s890_s0 + $0x50] sm:$0xff] }
  0x1a   :  { %546 = vmatmul.mubr.msk.f32.gmra.mxu0 %vm74_vm0, %v54_v31  ;;  %v62_v47 = vld [vmem:[%s891_s1 + $0x60] sm:$0xff]  ;;  %v29_v48 = vld [vmem:[%s890_s0 + $0x58] sm:$0xff]  ;;  %v63_v49 = vld [vmem:[%s891_s1 + $0x68] sm:$0xff] }
  0x1b   :  { %561 = vmatmul.mubr.msk.f32.gmra.mxu1 %vm284_vm1, %v21_v32  ;;  %217 = vmatprep.mubr.f32.mxu0 %v616_v18  ;;  %v30_v50 = vld [vmem:[%s890_s0 + $0x60] sm:$0xff]  ;;  %v64_v51 = vld [vmem:[%s891_s1 + $0x70] sm:$0xff]  ;;  %v31_v52 = vld [vmem:[%s890_s0 + $0x68] sm:$0xff] }
  0x1c   :  { %421 = vmatprep.mubr.f32.mxu1 %v616_v18  ;;  %356 = vmatpush1.msra.mxu0 %v42_v15  ;;  %v65_v53 = vld [vmem:[%s891_s1 + $0x78] sm:$0xff]  ;;  %v32_v54 = vld [vmem:[%s890_s0 + $0x70] sm:$0xff]  ;;  %v18_v55 = vld [vmem:[%s890_s0] sm:$0xff] }
  0x1d   :  { %357 = vmatprep.subr.mxu0 %v41_v17  ;;  %v33_v56 = vld [vmem:[%s890_s0 + $0x78] sm:$0xff]  ;;  %s617_s0 = smov [#allocation2]  }
  0x1e   :  { %547 = vmatmul.mubr.msk.f32.gmra.mxu0 %vm74_vm0, %v55_v33  ;;  %s531_s17 = sshll.u32 %s617_s0, 4  ;;  %s532_s17 = int_to_ptr.vmem [resolvable:$true] %s531_s17 }
  0x1f   :  { %562 = vmatmul.mubr.msk.f32.gmra.mxu1 %vm284_vm1, %v22_v34  ;;  %223 = vmatprep.mubr.f32.mxu0 %v616_v18  ;;  %s594_s2 = scalar_lea.vmem %s532_s17, 4096  ;;  %p599_p1 = scmp.lt.s32.totalorder %s532_s17, %s532_s17 }
  0x20   :  { %427 = vmatprep.mubr.f32.mxu1 %v616_v18  ;;  %358 = vmatpush1.msra.mxu0 %v40_v19  ;;  %p595_p0 = scmp.ne.s32.totalorder %s532_s17, %s594_s2  ;;  %p600_p2 = scmp.lt.s32.totalorder %s594_s2, %s594_s2 }
  0x21   :  { %359 = vmatprep.subr.mxu0 %v39_v20 }
  0x22   :  { %548 = vmatmul.mubr.msk.f32.gmra.mxu0 %vm74_vm0, %v56_v35  ;;  %p601_p3 = por %p600_p2, %p599_p1 }
  0x23   :  { %563 = vmatmul.mubr.msk.f32.gmra.mxu1 %vm284_vm1, %v23_v36  ;;  %229 = vmatprep.mubr.f32.mxu0 %v616_v18 }
  0x24   :  { %433 = vmatprep.mubr.f32.mxu1 %v616_v18  ;;  %360 = vmatpush1.msra.mxu0 %v38_v21  ;;  %p602_p4 = pnand %p601_p3, %p595_p0 }
  0x25   :  { %361 = vmatprep.subr.mxu0 %v37_v23 }
  0x26   :  { %549 = vmatmul.mubr.msk.f32.gmra.mxu0 %vm74_vm0, %v57_v37 }
  0x27   :  { %564 = vmatmul.mubr.msk.f32.gmra.mxu1 %vm284_vm1, %v24_v38  ;;  %235 = vmatprep.mubr.f32.mxu0 %v616_v18 }
  0x28   :  { %439 = vmatprep.mubr.f32.mxu1 %v616_v18  ;;  %362 = vmatpush1.msra.mxu0 %v36_v24 }
  0x29   :  { %363 = vmatprep.subr.mxu0 %v35_v25 }
  0x2a   :  { %550 = vmatmul.mubr.msk.f32.gmra.mxu0 %vm74_vm0, %v58_v39 }
  0x2b   :  { %565 = vmatmul.mubr.msk.f32.gmra.mxu1 %vm284_vm1, %v25_v40  ;;  %241 = vmatprep.mubr.f32.mxu0 %v616_v18 }
  0x2c   :  { %445 = vmatprep.mubr.f32.mxu1 %v616_v18  ;;  %364 = vmatpush1.msra.mxu0 %v728_v26 }
  0x2e   :  { %551 = vmatmul.mubr.msk.f32.gmra.mxu0 %vm74_vm0, %v59_v41 }
  0x2f   :  { %566 = vmatmul.mubr.msk.f32.gmra.mxu1 %vm284_vm1, %v26_v42  ;;  %247 = vmatprep.mubr.f32.mxu0 %v616_v18 }
  0x30   :  { %451 = vmatprep.mubr.f32.mxu1 %v616_v18 }
  0x32   :  { %552 = vmatmul.mubr.msk.f32.gmra.mxu0 %vm74_vm0, %v60_v43 }
  0x33   :  { %567 = vmatmul.mubr.msk.f32.gmra.mxu1 %vm284_vm1, %v27_v44  ;;  %253 = vmatprep.mubr.f32.mxu0 %v616_v18 }
  0x34   :  { %457 = vmatprep.mubr.f32.mxu1 %v616_v18 }
  0x36   :  { %553 = vmatmul.mubr.msk.f32.gmra.mxu0 %vm74_vm0, %v61_v45 }
  0x37   :  { %568 = vmatmul.mubr.msk.f32.gmra.mxu1 %vm284_vm1, %v28_v46  ;;  %259 = vmatprep.mubr.f32.mxu0 %v616_v18 }
  0x38   :  { %463 = vmatprep.mubr.f32.mxu1 %v616_v18 }
  0x3a   :  { %554 = vmatmul.mubr.msk.f32.gmra.mxu0 %vm74_vm0, %v62_v47 }
  0x3b   :  { %569 = vmatmul.mubr.msk.f32.gmra.mxu1 %vm284_vm1, %v29_v48  ;;  %265 = vmatprep.mubr.f32.mxu0 %v616_v18 }
  0x3c   :  { %469 = vmatprep.mubr.f32.mxu1 %v616_v18 }
  0x3e   :  { %555 = vmatmul.mubr.msk.f32.gmra.mxu0 %vm74_vm0, %v63_v49 }
  0x3f   :  { %570 = vmatmul.mubr.msk.f32.gmra.mxu1 %vm284_vm1, %v30_v50  ;;  %271 = vmatprep.mubr.f32.mxu0 %v616_v18 }
  0x40   :  { %475 = vmatprep.mubr.f32.mxu1 %v616_v18 }
  0x42   :  { %556 = vmatmul.mubr.msk.f32.gmra.mxu0 %vm74_vm0, %v64_v51 }
  0x43   :  { %571 = vmatmul.mubr.msk.f32.gmra.mxu1 %vm284_vm1, %v31_v52  ;;  %277 = vmatprep.mubr.f32.mxu0 %v616_v18 }
  0x44   :  { %481 = vmatprep.mubr.f32.mxu1 %v616_v18 }
  0x46   :  { %557 = vmatmul.mubr.msk.f32.gmra.mxu0 %vm74_vm0, %v65_v53 }
  0x47   :  { %572 = vmatmul.mubr.msk.f32.gmra.mxu1 %vm284_vm1, %v32_v54  ;;  %397 = vmatprep.mubr.f32.mxu0 %v616_v18 }
  0x48   :  { %487 = vmatprep.mubr.f32.mxu1 %v616_v18 }
  0x4a   :  { %558 = vmatmul.mubr.msk.f32.vlgmr.msra.gmra.mxu0 %vm284_vm1, %v18_v55 }
  0x4b   :  { %573 = vmatmul.mubr.msk.f32.gmra.mxu1 %vm284_vm1, %v33_v56 }
  0xca   :  { %v881_v57 = vpop.f32.mrf.mxu0 }
  0xcc   :  { %v883_v58 = vpop.f32.mrf.mxu0 }
  0xce   :  { %v195_v59 = vpop.f32.mrf.mxu0 }
  0xd0   :  { %v197_v60 = vpop.f32.mrf.mxu0 }
  0xd2   :  { %v201_v61 = vpop.f32.mrf.mxu0 }
  0xd3   :  { %v405_v62 = vpop.f32.mrf.mxu1 }
  0xd4   :  { %v406_v63 = vadd.f32 %v405_v62, %v195_v59  ;;  %v203_v0 = vpop.f32.mrf.mxu0 }
  0xd5   :  { %v407_v1 = vpop.f32.mrf.mxu1 }
  0xd6   :  { %496 = vst [vmem:[#allocation2 + $0x10] sm:$0xff] %v406_v63  ;;  %v408_v2 = vadd.f32 %v407_v1, %v197_v60  ;;  %v207_v3 = vpop.f32.mrf.mxu0 }
  0xd7   :  { %v411_v4 = vpop.f32.mrf.mxu1 }
  0xd8   :  { %497 = vst [vmem:[#allocation2 + $0x18] sm:$0xff] %v408_v2  ;;  %v412_v5 = vadd.f32 %v411_v4, %v201_v61  ;;  %v209_v6 = vpop.f32.mrf.mxu0 }
  0xd9   :  { %v413_v7 = vpop.f32.mrf.mxu1 }
  0xda   :  { %498 = vst [vmem:[#allocation2 + $0x20] sm:$0xff] %v412_v5  ;;  %v414_v8 = vadd.f32 %v413_v7, %v203_v0  ;;  %v213_v9 = vpop.f32.mrf.mxu0 }
  0xdb   :  { %v417_v10 = vpop.f32.mrf.mxu1 }
  0xdc   :  { %499 = vst [vmem:[#allocation2 + $0x28] sm:$0xff] %v414_v8  ;;  %v418_v11 = vadd.f32 %v417_v10, %v207_v3  ;;  %v215_v12 = vpop.f32.mrf.mxu0 }
  0xdd   :  { %v419_v13 = vpop.f32.mrf.mxu1 }
  0xde   :  { %500 = vst [vmem:[#allocation2 + $0x30] sm:$0xff] %v418_v11  ;;  %v420_v14 = vadd.f32 %v419_v13, %v209_v6  ;;  %v219_v15 = vpop.f32.mrf.mxu0 }
  0xdf   :  { %v423_v16 = vpop.f32.mrf.mxu1 }
  0xe0   :  { %501 = vst [vmem:[#allocation2 + $0x38] sm:$0xff] %v420_v14  ;;  %v424_v17 = vadd.f32 %v423_v16, %v213_v9  ;;  %v221_v18 = vpop.f32.mrf.mxu0 }
  0xe1   :  { %v425_v19 = vpop.f32.mrf.mxu1 }
  0xe2   :  { %502 = vst [vmem:[#allocation2 + $0x40] sm:$0xff] %v424_v17  ;;  %v426_v20 = vadd.f32 %v425_v19, %v215_v12  ;;  %v225_v21 = vpop.f32.mrf.mxu0 }
  0xe3   :  { %v429_v22 = vpop.f32.mrf.mxu1 }
  0xe4   :  { %503 = vst [vmem:[#allocation2 + $0x48] sm:$0xff] %v426_v20  ;;  %v430_v23 = vadd.f32 %v429_v22, %v219_v15  ;;  %v227_v24 = vpop.f32.mrf.mxu0 }
  0xe5   :  { %v431_v25 = vpop.f32.mrf.mxu1 }
  0xe6   :  { %504 = vst [vmem:[#allocation2 + $0x50] sm:$0xff] %v430_v23  ;;  %v432_v26 = vadd.f32 %v431_v25, %v221_v18  ;;  %v231_v27 = vpop.f32.mrf.mxu0 }
  0xe7   :  { %v435_v28 = vpop.f32.mrf.mxu1 }
  0xe8   :  { %505 = vst [vmem:[#allocation2 + $0x58] sm:$0xff] %v432_v26  ;;  %v436_v29 = vadd.f32 %v435_v28, %v225_v21  ;;  %v233_v30 = vpop.f32.mrf.mxu0 }
  0xe9   :  { %v437_v31 = vpop.f32.mrf.mxu1 }
  0xea   :  { %506 = vst [vmem:[#allocation2 + $0x60] sm:$0xff] %v436_v29  ;;  %v438_v32 = vadd.f32 %v437_v31, %v227_v24  ;;  %v237_v33 = vpop.f32.mrf.mxu0 }
  0xeb   :  { %v441_v34 = vpop.f32.mrf.mxu1 }
  0xec   :  { %507 = vst [vmem:[#allocation2 + $0x68] sm:$0xff] %v438_v32  ;;  %v442_v35 = vadd.f32 %v441_v34, %v231_v27  ;;  %v239_v36 = vpop.f32.mrf.mxu0 }
  0xed   :  { %v443_v37 = vpop.f32.mrf.mxu1 }
  0xee   :  { %508 = vst [vmem:[#allocation2 + $0x70] sm:$0xff] %v442_v35  ;;  %v444_v38 = vadd.f32 %v443_v37, %v233_v30  ;;  %v243_v39 = vpop.f32.mrf.mxu0 }
  0xef   :  { %v447_v40 = vpop.f32.mrf.mxu1 }
  0xf0   :  { %509 = vst [vmem:[#allocation2 + $0x78] sm:$0xff] %v444_v38  ;;  %v448_v41 = vadd.f32 %v447_v40, %v237_v33  ;;  %v245_v42 = vpop.f32.mrf.mxu0 }
  0xf1   :  { %v449_v43 = vpop.f32.mrf.mxu1 }
  0xf2   :  { %510 = vst [vmem:[#allocation2 + $0x80] sm:$0xff] %v448_v41  ;;  %v450_v44 = vadd.f32 %v449_v43, %v239_v36  ;;  %v249_v45 = vpop.f32.mrf.mxu0 }
  0xf3   :  { %v453_v46 = vpop.f32.mrf.mxu1 }
  0xf4   :  { %511 = vst [vmem:[#allocation2 + $0x88] sm:$0xff] %v450_v44  ;;  %v454_v47 = vadd.f32 %v453_v46, %v243_v39  ;;  %v251_v48 = vpop.f32.mrf.mxu0 }
  0xf5   :  { %v455_v49 = vpop.f32.mrf.mxu1 }
  0xf6   :  { %512 = vst [vmem:[#allocation2 + $0x90] sm:$0xff] %v454_v47  ;;  %v456_v50 = vadd.f32 %v455_v49, %v245_v42  ;;  %v255_v51 = vpop.f32.mrf.mxu0 }
  0xf7   :  { %v459_v52 = vpop.f32.mrf.mxu1 }
  0xf8   :  { %513 = vst [vmem:[#allocation2 + $0x98] sm:$0xff] %v456_v50  ;;  %v460_v53 = vadd.f32 %v459_v52, %v249_v45  ;;  %v257_v54 = vpop.f32.mrf.mxu0 }
  0xf9   :  { %v461_v55 = vpop.f32.mrf.mxu1 }
  0xfa   :  { %514 = vst [vmem:[#allocation2 + $0xa0] sm:$0xff] %v460_v53  ;;  %v462_v56 = vadd.f32 %v461_v55, %v251_v48  ;;  %v261_v59 = vpop.f32.mrf.mxu0 }
  0xfb   :  { %v465_v60 = vpop.f32.mrf.mxu1 }
  0xfc   :  { %515 = vst [vmem:[#allocation2 + $0xa8] sm:$0xff] %v462_v56  ;;  %v466_v61 = vadd.f32 %v465_v60, %v255_v51  ;;  %v263_v62 = vpop.f32.mrf.mxu0 }
  0xfd   :  { %v467_v63 = vpop.f32.mrf.mxu1 }
  0xfe   :  { %516 = vst [vmem:[#allocation2 + $0xb0] sm:$0xff] %v466_v61  ;;  %v468_v0 = vadd.f32 %v467_v63, %v257_v54  ;;  %v267_v1 = vpop.f32.mrf.mxu0 }
  0xff   :  { %v471_v2 = vpop.f32.mrf.mxu1 }
 0x100   :  { %517 = vst [vmem:[#allocation2 + $0xb8] sm:$0xff] %v468_v0  ;;  %v472_v3 = vadd.f32 %v471_v2, %v261_v59  ;;  %v269_v4 = vpop.f32.mrf.mxu0 }
 0x101   :  { %v473_v5 = vpop.f32.mrf.mxu1 }
 0x102   :  { %518 = vst [vmem:[#allocation2 + $0xc0] sm:$0xff] %v472_v3  ;;  %v474_v6 = vadd.f32 %v473_v5, %v263_v62  ;;  %v273_v7 = vpop.f32.mrf.mxu0 }
 0x103   :  { %v477_v8 = vpop.f32.mrf.mxu1 }
 0x104   :  { %519 = vst [vmem:[#allocation2 + $0xc8] sm:$0xff] %v474_v6  ;;  %v478_v9 = vadd.f32 %v477_v8, %v267_v1  ;;  %v275_v10 = vpop.f32.mrf.mxu0 }
 0x105   :  { %v479_v11 = vpop.f32.mrf.mxu1 }
 0x106   :  { %520 = vst [vmem:[#allocation2 + $0xd0] sm:$0xff] %v478_v9  ;;  %v480_v12 = vadd.f32 %v479_v11, %v269_v4  ;;  %v279_v13 = vpop.f32.mrf.mxu0 }
 0x107   :  { %v483_v14 = vpop.f32.mrf.mxu1 }
 0x108   :  { %521 = vst [vmem:[#allocation2 + $0xd8] sm:$0xff] %v480_v12  ;;  %v484_v15 = vadd.f32 %v483_v14, %v273_v7  ;;  %v281_v16 = vpop.f32.mrf.mxu0 }
 0x109   :  { %v485_v17 = vpop.f32.mrf.mxu1 }
 0x10a   :  { %522 = vst [vmem:[#allocation2 + $0xe0] sm:$0xff] %v484_v15  ;;  %v486_v18 = vadd.f32 %v485_v17, %v275_v10  ;;  %v399_v19 = vpop.f32.mrf.mxu0 }
 0x10b   :  { %v400_v20 = vadd.f32 %v399_v19, %v881_v57  ;;  %v489_v21 = vpop.f32.mrf.mxu1 }
 0x10c   :  { %523 = vst [vmem:[#allocation2 + $0xe8] sm:$0xff] %v486_v18  ;;  %v490_v22 = vadd.f32 %v489_v21, %v279_v13  ;;  %v401_v23 = vpop.f32.mrf.mxu0 }
 0x10d   :  { %494 = vst [vmem:[#allocation2] sm:$0xff] %v400_v20  ;;  %v402_v24 = vadd.f32 %v401_v23, %v883_v58  ;;  %v491_v25 = vpop.f32.mrf.mxu1 }
 0x10e   :  { %524 = vst [vmem:[#allocation2 + $0xf0] sm:$0xff] %v490_v22  ;;  %v492_v26 = vadd.f32 %v491_v25, %v281_v16 }
 0x10f   :  { %495 = vst [vmem:[#allocation2 + $0x8] sm:$0xff] %v402_v24 }
 0x110   :  { %525 = vst [vmem:[#allocation2 + $0xf8] sm:$0xff] %v492_v26 }
 0x111   :  { %605 = shalt.err (!%p602_p4)
}
 0x112   :  { %s618_s18 = smov 256   ;;  %s619_s19 = smov 16  }
 0x113   :  { %537 = dma.vmem_to_hbm [thread:$0]  %s532_s17, 4096, %s894_s4, [#allocation3], %s618_s18, %s618_s18, %s619_s19  }
 0x114   :  { %614 = dma.done.wait [#allocation3], 4096  }
 0x115   :  { %615 = vsyncadd [#allocation3], 4294963200 }
 0x116   :  { %541 = vsyncpa [#allocation3], 1 }

</bundles_post_ra>
